<compile_context>
chip_gen: v6e
topology: v6e:2x2x1
jax: 0.10.0
libtpu: 0.0.40
codegen_flags: <defaults>
</compile_context>

<pallas_src>
import functools

import jax
import jax.numpy as jnp
from jax import lax
from jax.experimental import pallas as pl
from jax.experimental.pallas import tpu as pltpu

EPS = 1e-5  # nn.LayerNorm default


def _round_up(n, m):
    return ((n + m - 1) // m) * m


def _round_down8(n):
    return max(8, (n // 8) * 8)


def _vmem_capacity_bytes():
    try:
        info = pltpu.get_tpu_info()
        cap = getattr(info, "vmem_capacity_bytes", None)
        if cap:
            return int(cap)
    except Exception:
        pass
    return 64 * 1024 * 1024  # conservative fallback (v7x per-core physical VMEM)


def _next_smaller_col_tile(Ep, col_tile):
    """Largest multiple of 128 that divides Ep and is < col_tile (floor 128)."""
    lanes = Ep // 128
    for k in range(col_tile // 128 - 1, 0, -1):
        if lanes % k == 0:
            return k * 128
    return 128


def _vmem_estimate(row_tile, col_tile, Ep, xbytes):
    """Conservative VMEM estimate: double-buffered blocks + scratch + kernel temporaries."""
    x_blocks = 2 * row_tile * Ep * xbytes            # double-buffered x row tile
    out_blocks = 2 * row_tile * col_tile * xbytes    # double-buffered output tile
    w_blocks = 2 * Ep * col_tile * 2                 # double-buffered bf16 W column slab
    b_blocks = 2 * col_tile * 4                      # double-buffered bias slab
    vectors = 2 * Ep * 4 * 2                         # gamma / beta (resident, single copy)
    y_scratch = row_tile * Ep * 2                    # bf16 LN-output scratch
    # kernel-internal temporaries: x(f32), centered, xn/y plus z / x_cols
    temps = 3 * row_tile * Ep * 4 + 2 * row_tile * col_tile * 4
    return x_blocks + out_blocks + w_blocks + b_blocks + vectors + y_scratch + temps


def _sublayer_kernel(x_ref, gamma_ref, beta_ref, w_ref, b_ref, o_ref, y_ref,
                     *, inv_embed, true_e, needs_mask, col_tile, n_col_steps):
    j = pl.program_id(1)

    # --- LayerNorm (f32 VPU, two-pass centered variance), once per row tile ---
    @pl.when(j == 0)
    def _():
        x = x_ref[...].astype(jnp.float32)
        mean = jnp.sum(x, axis=-1, keepdims=True) * inv_embed
        centered = x - mean
        if needs_mask:
            # Padded lanes (>= true_e) must not contribute to the centered sum.
            lane = lax.broadcasted_iota(jnp.int32, x.shape, dimension=1)
            centered = jnp.where(lane < true_e, centered, 0.0)
        var = jnp.sum(centered * centered, axis=-1, keepdims=True) * inv_embed
        xn = centered * lax.rsqrt(var + EPS)
        y = xn * gamma_ref[...].astype(jnp.float32) + beta_ref[...].astype(jnp.float32)
        y_ref[...] = y.astype(jnp.bfloat16)

    # --- sublayer: Linear(embed, embed) column slab on the MXU (bf16 operands, f32 acc) ---
    z = jnp.dot(y_ref[...], w_ref[...], preferred_element_type=jnp.float32)
    z = z + b_ref[...].astype(jnp.float32)

    # --- dropout (eval mode) is the identity ---
    # TODO(synk): training-mode dropout would use pltpu.prng_seed / pltpu.prng_random_bits.

    # --- residual add (f32) on the matching x column slab ---
    if n_col_steps == 1:
        x_cols = x_ref[...]
    else:
        start = pl.multiple_of(j * col_tile, col_tile)
        x_cols = x_ref[:, pl.ds(start, col_tile)]
    o_ref[...] = (x_cols.astype(jnp.float32) + z).astype(o_ref.dtype)


def prepare_sublayer_params(gamma, beta, w, b):
    """Pad parameters to a lane-dense embed width and cast W to bf16 ONCE per parameter set
    (hoisted out of the per-call wrapper; under jit with constant params XLA folds this)."""
    E = w.shape[0]
    Ep = E if E % 128 == 0 else _round_up(E, 128)
    gamma2 = jnp.zeros((1, Ep), jnp.float32).at[0, :E].set(gamma.astype(jnp.float32))
    beta2 = jnp.zeros((1, Ep), jnp.float32).at[0, :E].set(beta.astype(jnp.float32))
    b2 = jnp.zeros((1, Ep), jnp.float32).at[0, :E].set(b.astype(jnp.float32))
    w2 = jnp.zeros((Ep, Ep), jnp.bfloat16).at[:E, :E].set(w.astype(jnp.bfloat16))
    return gamma2, beta2, w2, b2, E


def sublayer_connection(x, prepared):
    """x: [B, S, E] -> [B, S, E]; computes x + Linear(LayerNorm(x)) (eval-mode dropout)."""
    gamma2, beta2, w2, b2, E = prepared
    B, S, _ = x.shape
    assert x.shape[-1] == E
    N = B * S
    Ep = w2.shape[0]
    xbytes = jnp.dtype(x.dtype).itemsize

    # Activations: no O(N*E) pad when E is already lane-dense (the common case).
    if Ep == E:
        x2 = x.reshape(N, E)                         # free reshape, no HBM copy
    else:
        x2 = jnp.zeros((N, Ep), x.dtype).at[:, :E].set(x.reshape(N, E))

    # --- tile selection ---------------------------------------------------------------
    vmem_cap = _vmem_capacity_bytes()
    vmem_limit = int(vmem_cap * 0.85)                # ~15% headroom for Mosaic internals

    # ~8 MiB of f32 rows per tile, clamped to [256, 2048], then to the actual row count.
    row_tile = _round_down8(min(2048, max(256, (8 * 1024 * 1024) // (Ep * 4))))
    row_tile = min(row_tile, _round_up(N, 8))
    # Keep >= 4 (>= 2 for small N) row steps so "parallel" can shard the grid across the
    # two TensorCores of a v7x chip (no-op on single-TC v5e/v6e).
    if N >= 32:
        row_tile = min(row_tile, _round_down8(N // 4))
    elif N >= 16:
        row_tile = min(row_tile, _round_down8(N // 2))

    # W streams in (Ep, col_tile) bf16 slabs; shrink col_tile (then row_tile) until
    # everything — including double buffers and kernel temporaries — fits the budget.
    col_tile = Ep
    while _vmem_estimate(row_tile, col_tile, Ep, xbytes) > vmem_limit:
        if col_tile > 128:
            col_tile = _next_smaller_col_tile(Ep, col_tile)
        elif row_tile > 8:
            row_tile = _round_down8(row_tile // 2)
        else:
            break
    n_row_steps = pl.cdiv(N, row_tile)
    n_col_steps = Ep // col_tile

    kernel = functools.partial(
        _sublayer_kernel,
        inv_embed=1.0 / E, true_e=E, needs_mask=(Ep != E),
        col_tile=col_tile, n_col_steps=n_col_steps)

    out2 = pl.pallas_call(
        kernel,
        out_shape=jax.ShapeDtypeStruct((N, Ep), x.dtype),
        grid_spec=pltpu.PrefetchScalarGridSpec(
            num_scalar_prefetch=0,
            grid=(n_row_steps, n_col_steps),
            in_specs=[
                pl.BlockSpec((row_tile, Ep), lambda i, j: (i, 0)),     # x row tile
                pl.BlockSpec(memory_space=pltpu.MemorySpace.VMEM),     # gamma (resident)
                pl.BlockSpec(memory_space=pltpu.MemorySpace.VMEM),     # beta (resident)
                pl.BlockSpec((Ep, col_tile), lambda i, j: (0, j)),     # bf16 W column slab
                pl.BlockSpec((1, col_tile), lambda i, j: (0, j)),      # bias slab
            ],
            out_specs=pl.BlockSpec((row_tile, col_tile), lambda i, j: (i, j)),
            scratch_shapes=[pltpu.VMEM((row_tile, Ep), jnp.bfloat16)],  # LN output, reused
        ),
        compiler_params=pltpu.CompilerParams(
            dimension_semantics=("parallel", "arbitrary"),
            vmem_limit_bytes=vmem_limit,
        ),
    )(x2, gamma2, beta2, w2, b2)

    if Ep == E:
        return out2.reshape(B, S, E)                 # no slice copy on the output either
    return out2[:, :E].reshape(B, S, E)


def reference(x, gamma, beta, w, b):
    """Pure-JAX reference mirroring the kernel's precision contract (bf16 MXU operands, f32 else)."""
    xf = x.astype(jnp.float32)
    mean = jnp.mean(xf, axis=-1, keepdims=True)
    var = jnp.mean((xf - mean) ** 2, axis=-1, keepdims=True)
    xn = (xf - mean) * lax.rsqrt(var + EPS)
    y = xn * gamma.astype(jnp.float32) + beta.astype(jnp.float32)
    z = jnp.einsum("bse,ef->bsf", y.astype(jnp.bfloat16), w.astype(jnp.bfloat16),
                   preferred_element_type=jnp.float32) + b.astype(jnp.float32)
    return (xf + z).astype(x.dtype)


if __name__ == "__main__":
    key = jax.random.PRNGKey(0)
    B, S, E = 2, 8, 32

    kx, kw, kb = jax.random.split(key, 3)
    x = jax.random.normal(kx, (B, S, E), dtype=jnp.float32)

    # LayerNorm params as initialized by nn.LayerNorm (ones / zeros)
    gamma = jnp.ones((E,), dtype=jnp.float32)
    beta = jnp.zeros((E,), dtype=jnp.float32)

    # Deterministic weights for the `layer` sublayer (Linear(E, E))
    w = jax.random.normal(kw, (E, E), dtype=jnp.float32) * (1.0 / jnp.sqrt(E))
    b = jax.random.normal(kb, (E,), dtype=jnp.float32) * 0.01

    prepared = prepare_sublayer_params(gamma, beta, w, b)
    out = sublayer_connection(x, prepared)
    out = jax.block_until_ready(out)

    ref = reference(x, gamma, beta, w, b)
    assert out.shape == (B, S, E)
    assert jnp.allclose(out, ref, atol=1e-2, rtol=1e-2), "mismatch vs reference"

    print("KERNEL_OK")
</pallas_src>

<mosaic_0001>
module attributes {stable_mosaic.version = 11 : i64} {
  func.func @_sublayer_kernel(%arg0: i32, %arg1: i32, %arg2: memref<8x128xf32, #tpu.memory_space<vmem>>, %arg3: memref<1x128xf32, #tpu.memory_space<vmem>>, %arg4: memref<1x128xf32, #tpu.memory_space<vmem>>, %arg5: memref<128x128xbf16, #tpu.memory_space<vmem>>, %arg6: memref<1x128xf32, #tpu.memory_space<vmem>>, %arg7: memref<8x128xf32, #tpu.memory_space<vmem>>, %arg8: memref<8x128xbf16, #tpu.memory_space<vmem>>) attributes {dimension_semantics = [#tpu.dimension_semantics<parallel>, #tpu.dimension_semantics<arbitrary>], iteration_bounds = array<i64: 2, 1>, scalar_prefetch = 0 : i64, scratch_operands = 1 : i64, tpu.core_type = #tpu.core_type<tc>, window_params = [{transform_indices = @transform_0, window_bounds = array<i64: 8, 128>}, {pipeline_mode = #tpu.pipeline_mode<synchronous>, transform_indices = @transform_1, window_bounds = array<i64: 1, 128>}, {pipeline_mode = #tpu.pipeline_mode<synchronous>, transform_indices = @transform_2, window_bounds = array<i64: 1, 128>}, {transform_indices = @transform_3, window_bounds = array<i64: 128, 128>}, {transform_indices = @transform_4, window_bounds = array<i64: 1, 128>}, {transform_indices = @transform_5, window_bounds = array<i64: 8, 128>}]} {
    %c0_i32 = arith.constant 0 : i32
    %0 = arith.cmpi eq, %arg1, %c0_i32 : i32
    %1 = arith.extui %0 : i1 to i32
    %c0_i32_0 = arith.constant 0 : i32
    %2 = arith.cmpi ne, %1, %c0_i32_0 : i32
    scf.if %2 {
      %c0_10 = arith.constant 0 : index
      %c0_11 = arith.constant 0 : index
      %12 = vector.load %arg2[%c0_10, %c0_11] : memref<8x128xf32, #tpu.memory_space<vmem>>, vector<8x128xf32>
      %cst_12 = arith.constant dense<0.000000e+00> : vector<8xf32>
      %13 = vector.multi_reduction <add>, %12, %cst_12 [1] : vector<8x128xf32> to vector<8xf32>
      %14 = vector.shape_cast %13 : vector<8xf32> to vector<8x1xf32>
      %cst_13 = arith.constant 3.125000e-02 : f32
      %15 = vector.broadcast %cst_13 : f32 to vector<8x1xf32>
      %16 = arith.mulf %14, %15 : vector<8x1xf32>
      %17 = vector.broadcast %16 : vector<8x1xf32> to vector<8x128xf32>
      %18 = arith.subf %12, %17 : vector<8x128xf32>
      %19 = tpu.iota {dimensions = array<i32: 1>} : vector<8x128xi32>
      %c32_i32 = arith.constant 32 : i32
      %20 = vector.broadcast %c32_i32 : i32 to vector<8x128xi32>
      %21 = arith.cmpi slt, %19, %20 : vector<8x128xi32>
      %cst_14 = arith.constant 0.000000e+00 : f32
      %22 = vector.broadcast %cst_14 : f32 to vector<8x128xf32>
      %23 = arith.select %21, %18, %22 : vector<8x128xi1>, vector<8x128xf32>
      %24 = arith.mulf %23, %23 : vector<8x128xf32>
      %cst_15 = arith.constant dense<0.000000e+00> : vector<8xf32>
      %25 = vector.multi_reduction <add>, %24, %cst_15 [1] : vector<8x128xf32> to vector<8xf32>
      %26 = vector.shape_cast %25 : vector<8xf32> to vector<8x1xf32>
      %cst_16 = arith.constant 3.125000e-02 : f32
      %27 = vector.broadcast %cst_16 : f32 to vector<8x1xf32>
      %28 = arith.mulf %26, %27 : vector<8x1xf32>
      %cst_17 = arith.constant 9.99999974E-6 : f32
      %29 = vector.broadcast %cst_17 : f32 to vector<8x1xf32>
      %30 = arith.addf %28, %29 : vector<8x1xf32>
      %31 = math.rsqrt %30 : vector<8x1xf32>
      %32 = vector.broadcast %31 : vector<8x1xf32> to vector<8x128xf32>
      %33 = arith.mulf %23, %32 : vector<8x128xf32>
      %c0_18 = arith.constant 0 : index
      %c0_19 = arith.constant 0 : index
      %34 = vector.load %arg3[%c0_18, %c0_19] : memref<1x128xf32, #tpu.memory_space<vmem>>, vector<1x128xf32>
      %35 = vector.broadcast %34 : vector<1x128xf32> to vector<8x128xf32>
      %36 = arith.mulf %33, %35 : vector<8x128xf32>
      %c0_20 = arith.constant 0 : index
      %c0_21 = arith.constant 0 : index
      %37 = vector.load %arg4[%c0_20, %c0_21] : memref<1x128xf32, #tpu.memory_space<vmem>>, vector<1x128xf32>
      %38 = vector.broadcast %37 : vector<1x128xf32> to vector<8x128xf32>
      %39 = arith.addf %36, %38 : vector<8x128xf32>
      %40 = arith.truncf %39 : vector<8x128xf32> to vector<8x128xbf16>
      %c0_22 = arith.constant 0 : index
      %c0_23 = arith.constant 0 : index
      %41 = vector.load %arg8[%c0_22, %c0_23] : memref<8x128xbf16, #tpu.memory_space<vmem>>, vector<8x128xbf16>
      tpu.vector_store %arg8[%c0_22, %c0_23], %40 {strides = array<i32>} : memref<8x128xbf16, #tpu.memory_space<vmem>>, vector<8x128xbf16>,
    } else {
    }
    %c0 = arith.constant 0 : index
    %c0_1 = arith.constant 0 : index
    %3 = vector.load %arg8[%c0, %c0_1] : memref<8x128xbf16, #tpu.memory_space<vmem>>, vector<8x128xbf16>
    %c0_2 = arith.constant 0 : index
    %c0_3 = arith.constant 0 : index
    %4 = vector.load %arg5[%c0_2, %c0_3] : memref<128x128xbf16, #tpu.memory_space<vmem>>, vector<128x128xbf16>
    %cst = arith.constant dense<0.000000e+00> : vector<8x128xf32>
    %5 = tpu.matmul %3, %4, %cst {dimension_numbers = #tpu.dot_dimension_numbers<[1], [0], [0], [1], [0, 0, 1, 1], [], []>} : vector<8x128xbf16>, vector<128x128xbf16>, vector<8x128xf32> -> vector<8x128xf32>
    %c0_4 = arith.constant 0 : index
    %c0_5 = arith.constant 0 : index
    %6 = vector.load %arg6[%c0_4, %c0_5] : memref<1x128xf32, #tpu.memory_space<vmem>>, vector<1x128xf32>
    %7 = vector.broadcast %6 : vector<1x128xf32> to vector<8x128xf32>
    %8 = arith.addf %5, %7 : vector<8x128xf32>
    %c0_6 = arith.constant 0 : index
    %c0_7 = arith.constant 0 : index
    %9 = vector.load %arg2[%c0_6, %c0_7] : memref<8x128xf32, #tpu.memory_space<vmem>>, vector<8x128xf32>
    %10 = arith.addf %9, %8 : vector<8x128xf32>
    %c0_8 = arith.constant 0 : index
    %c0_9 = arith.constant 0 : index
    %11 = vector.load %arg7[%c0_8, %c0_9] : memref<8x128xf32, #tpu.memory_space<vmem>>, vector<8x128xf32>
    tpu.vector_store %arg7[%c0_8, %c0_9], %10 {strides = array<i32>} : memref<8x128xf32, #tpu.memory_space<vmem>>, vector<8x128xf32>,
    return
  }
  func.func @transform_0(%arg0: i32, %arg1: i32) -> (i32, i32) {
    %c0_i32 = arith.constant 0 : i32
    %c0_i32_0 = arith.constant 0 : i32
    return %arg0, %c0_i32 : i32, i32
  }
  func.func @transform_1(%arg0: i32, %arg1: i32) -> (i32, i32) {
    %c0_i32 = arith.constant 0 : i32
    %c0_i32_0 = arith.constant 0 : i32
    %c0_i32_1 = arith.constant 0 : i32
    return %c0_i32, %c0_i32_0 : i32, i32
  }
  func.func @transform_2(%arg0: i32, %arg1: i32) -> (i32, i32) {
    %c0_i32 = arith.constant 0 : i32
    %c0_i32_0 = arith.constant 0 : i32
    %c0_i32_1 = arith.constant 0 : i32
    return %c0_i32, %c0_i32_0 : i32, i32
  }
  func.func @transform_3(%arg0: i32, %arg1: i32) -> (i32, i32) {
    %c0_i32 = arith.constant 0 : i32
    %c0_i32_0 = arith.constant 0 : i32
    return %c0_i32, %arg1 : i32, i32
  }
  func.func @transform_4(%arg0: i32, %arg1: i32) -> (i32, i32) {
    %c0_i32 = arith.constant 0 : i32
    %c0_i32_0 = arith.constant 0 : i32
    return %c0_i32, %arg1 : i32, i32
  }
  func.func @transform_5(%arg0: i32, %arg1: i32) -> (i32, i32) {
    %c0_i32 = arith.constant 0 : i32
    return %arg0, %arg1 : i32, i32
  }
}

</mosaic_0001>

<bundles_post_ra>
// kernel: tpu_custom_call.1
= control target key start
LH: loop header
LB: loop body
LE: loop exit
PB: predicated region body
PF: predicated region fallthrough
CT: control target
= control target key end

     0   :  { %s1074_s0 = inlined_call_operand.hbm [shape: f32[16,128], index: 0, kind: input, shape index: {}]   ;;  %s1075_s1 = inlined_call_operand.vmem [shape: f32[1,128], index: 1, kind: input, shape index: {}]   ;;  %s1076_s2 = inlined_call_operand.vmem [shape: f32[1,128], index: 2, kind: input, shape index: {}]   ;;  %s1077_s3 = inlined_call_operand.hbm [shape: bf16[128,128], index: 3, kind: input, shape index: {}]   ;;  %s1078_s4 = inlined_call_operand.vmem [shape: f32[1,128], index: 4, kind: input, shape index: {}]   ;;  %s1079_s5 = inlined_call_operand.hbm [shape: f32[16,128], index: 5, kind: output, shape index: {}]  }
   0x1   :  { %1082 = sst [smem:[#allocation13_spill]] %s1077_s3 }
   0x2   :  { %10 = vsyncpa [#allocation4], 0 }
   0x3   :  { %12 = vsyncpa [#allocation4 + $0x1], 0 }
   0x4   :  { %13 = vsyncpa [#allocation7], 0 }
   0x5   :  { %14 = vsyncpa [#allocation5], 0 }
   0x6   :  { %16 = vsyncpa [#allocation5 + $0x1], 0  ;;  %s882_s18 = smov 0   ;;  %s884_s19 = smov 0  }
   0x7   :  { %s886_s20 = smov 0   ;;  %s888_s21 = smov 0  }
   0x8   :  { %s890_s22 = smov 0   ;;  %s892_s23 = smov 0  }
   0x9 LB: > { %s562_s24 = sadd.s32 4294967295, %s843_s23   ;;  %s563_s25 = sadd.s32 4294967294, %s843_s23   ;;  %s843_s23 = sphi %s892_s23, %s22_s23   ;;  %s839_s22 = sphi %s890_s22, %s1102_s22   ;;  %s835_s21 = sphi %s888_s21, %s1101_s21   ;;  %s831_s20 = sphi %s886_s20, %s1100_s20   ;;  %s827_s19 = sphi %s884_s19, %s1099_s19   ;;  %s823_s18 = sphi %s882_s18, %s1098_s18  }
   0xa   : > { %p54_p0 = scmp.ne.s32.totalorder %s827_s19, %s823_s18  ;;  %p916_p1 = scmp.eq.s32.totalorder %s562_s24, 0 }
   0xb   : > { %p920_p2 = scmp.eq.s32.totalorder %s562_s24, 1  ;;  %p180_p3 = scmp.eq.s32.totalorder %s563_s25, 1 }
   0xc   : > { %p926_p4 = por %p916_p1, %p54_p0  ;;  %p564_p5 = scmp.ge.s32.totalorder %s843_s23, 1 }
   0xd   : > { %p931_p6 = por %p180_p3, %p54_p0  ;;  %p187_p7 = scmp.lt.s32.totalorder %s843_s23, 3 }
   0xe   : > { %s1085_s28 = scalar_select %p926_p4, 1, 0 }
   0xf   : > { %s1086_s29 = scalar_select %p931_p6, 1, 0 }
  0x10   : > { %p936_p8 = pnand %p564_p5, %p187_p7  ;;  %s845_s6 = smov [#allocation6]  }
  0x11   : > { %s207_s7 = sshll.u32 %s845_s6, 4  ;;  %s34_s9 = sadd.s32 1, %s839_s22  ;;  %s208_s7 = int_to_ptr.vmem [resolvable:$true] %s207_s7 }
  0x12   : > { %p626_p9 = pneg %p936_p8  ;;  %s716_s10 = scalar_lea.vmem %s208_s7, 1024 }
  0x13   : > { %p717_p13 = scmp.ne.s32.totalorder %s208_s7, %s716_s10  ;;  %p724_p5 = scmp.lt.s32.totalorder %s208_s7, %s208_s7 }
  0x14   : > { %p945_p11 = pnand %p626_p9, %p916_p1  ;;  %p725_p7 = scmp.lt.s32.totalorder %s716_s10, %s716_s10 }
  0x16   : > { %p707_p12 = pneg %p945_p11  ;;  %p726_p6 = por %p725_p7, %p724_p5 }
  0x18   : > { %p719_p0 = pnand %p717_p13, %p707_p12 }
  0x1a   : > { %p720_p3 = pneg %p719_p0 }
  0x1c   : > { %p727_p4 = pnand %p726_p6, %p720_p3 }
  0x1e   : > { %730 = shalt.err (!%p727_p4)
}
  0x1f   : > { %s846_s11 = smov 64   ;;  %s847_s12 = smov 4  }
  0x20   : > { %s1089_s3 = sld [smem:[#allocation13_spill]]  ;;  %p36_p6 = scmp.ge.s32.totalorder %s34_s9, 2 }
  0x21   : > { %s41_s15 = sadd.s32 1, %s831_s20  ;;  %p48_p4 = scmp.ne.s32.totalorder %s831_s20, %s827_s19 }
  0x22   : > { %p49_p9 = scmp.eq.s32.totalorder %s843_s23, 0  ;;  %s1104_s9 = smov (%p36_p6, %s34_s9), 0 }
  0x23   : > { %1090 = sst [smem:[#allocation12_spill]] %s1104_s9  ;;  %p969_p13 = por %p920_p2, %p48_p4 }
  0x24   : > { %p963_p12 = por %p49_p9, %p48_p4  ;;  %s38_s24 = ssub.s32 %s839_s22, %s1104_s9 }
  0x25   : > { %p639_p0 = scmp.lt.s32.totalorder %s843_s23, 2  ;;  %s227_s25 = sand.u32 1, %s831_s20  }
  0x26   : > { %629 = dma.hbm_to_vmem [thread:$0]  (!%p945_p11), %s1089_s3, 1024, %s208_s7, [#allocation7], %s846_s11, %s846_s11, %s847_s12  }
  0x27   : > { %p39_p11 = scmp.eq.s32.totalorder %s38_s24, 0  ;;  %s568_s6 = sshll.u32 %s227_s25, 3 }
  0x28   : > { %s569_s8 = sshll.u32 %s839_s22, 7  ;;  %s231_s13 = scalar_lea.vmem [#allocation3], %s568_s6 }
  0x29   : > { %s978_s7 = scalar_select %p39_p11, %s831_s20, %s41_s15  }
  0x2a   : > { %s236_s12 = scalar_lea.hbm %s1074_s0, %s569_s8  ;;  %s238_s14 = sshll.u32 %s231_s13, 4  ;;  %s239_s14 = int_to_ptr.vmem [resolvable:$true] %s238_s14 }
  0x2b   : > { %p986_p2 = pnand %p639_p0, %p963_p12  ;;  %s228_s3 = scalar_lea.sflag [#allocation4], %s227_s25 }
  0x2c   : > { %s744_s24 = scalar_lea.vmem %s239_s14, 128  ;;  %s848_s15 = smov [#allocation3]  }
  0x2d   : > { %p733_p3 = pneg %p986_p2  ;;  %p745_p5 = scmp.ne.s32.totalorder %s239_s14, %s744_s24 }
  0x2e   : > { %s749_s9 = sshll.u32 %s848_s15, 4  ;;  %s750_s9 = int_to_ptr.vmem [resolvable:$false] %s749_s9 }
  0x2f   : > { %p747_p7 = pnand %p745_p5, %p733_p3  ;;  %s751_s8 = scalar_lea.vmem %s750_s9, 256 }
  0x30   : > { %p752_p4 = scmp.lt.s32.totalorder %s239_s14, %s750_s9  ;;  %p753_p9 = scmp.lt.s32.totalorder %s751_s8, %s744_s24 }
  0x31   : > { %p748_p6 = pneg %p747_p7 }
  0x32   : > { %p754_p11 = por %p753_p9, %p752_p4 }
  0x34   : > { %p755_p10 = pnand %p754_p11, %p748_p6 }
  0x36   : > { %758 = shalt.err (!%p755_p10)
}
  0x37   : > { %633 = dma.hbm_to_vmem [thread:$0]  (!%p986_p2), %s236_s12, 128, %s239_s14, %s228_s3  }
  0x38   : > { %247 = sbr.rel (%p936_p8) target bundleno = 593 (0x251), region = 40  ;;  %s997_s16 = sand.u32 (!%p936_p8), 1, %s827_s19  }
  0x39   : > { %s571_s25 = sshll.u32 (!%p936_p8), %s997_s16, 3  ;;  %s250_s6 = scalar_lea.sflag (!%p936_p8), [#allocation4], %s997_s16 }
  0x3a   : > { %s253_s9 = scalar_lea.vmem (!%p936_p8), [#allocation3], %s571_s25  ;;  %p1094_p12 = scmp.ne.s32.totalorder (!%p936_p8), %s1085_s28, 0 }
  0x3d   : > { %810 = dma.done.wait (%p1094_p12), %s250_s6, 128  }
  0x3e   : > { %812 = vsyncadd (%p1094_p12), %s250_s6, 4294967168 }
  0x3f   : > { %814 = dma.done.wait (%p916_p1), [#allocation7], 1024  }
  0x40   : > { %816 = vsyncadd (%p916_p1), [#allocation7], 4294966272  ;;  %v295_v0 = vld [vmem:[%s253_s9] sm:$0xff]  ;;  %v300_v1 = vlaneseq  ;;  %v849_v9 = vmov 0.0   ;;  %v697_v11 = vld [vmem:[#allocation6 + $0x28] sm:$0xff]   ;;  %vm850_vm1 = vmmov 0  }
  0x41   : > { %296 = vadd.xlane.f32.xlu0 %v295_v0  ;;  %v695_v8 = vld [vmem:[#allocation6 + $0x38] sm:$0xff]   ;;  %598 = vmatprep.subr.bf16.mxu0 %v849_v9  ;;  %v696_v10 = vld [vmem:[#allocation6 + $0x30] sm:$0xff]   ;;  %v698_v12 = vld [vmem:[#allocation6 + $0x20] sm:$0xff]   ;;  %s586_s12 = sshll.u32 %s835_s21, 7  ;;  %s286_s13 = scalar_lea.vmem [#allocation8], %s571_s25 }
  0x42   : > { %v301_v2 = vand.u32 127, %v300_v1  ;;  %599 = vmatpush3.bf16.msra.mxu0 %v695_v8  ;;  %v699_v13 = vld [vmem:[#allocation6 + $0x18] sm:$0xff]   ;;  %v700_v14 = vld [vmem:[#allocation6 + $0x10] sm:$0xff]   ;;  %v701_v15 = vld [vmem:[#allocation6 + $0x8] sm:$0xff]   ;;  %614 = vmatprep.mubr.msk.bf16.mxu0 %vm850_vm1, %v849_v9  ;;  %s459_s14 = sshll.u32 %s286_s13, 4  ;;  %s1026_s15 = scalar_lea.hbm %s1079_s5, %s586_s12  ;;  %s1028_s14 = int_to_ptr.vmem [resolvable:$true] %s459_s14 }
  0x43   : > { %600 = vmatprep.subr.bf16.mxu0 %v849_v9  ;;  %v702_v16 = vld [vmem:[#allocation6] sm:$0xff]   ;;  %v574_v21 = vld [vmem:[%s1075_s1] ss:$0 sm:$0xff]  ;;  %s445_s21 = scalar_lea.sflag [#allocation5], %s997_s16  ;;  %s759_s8 = scalar_lea.vmem %s1028_s14, 128 }
  0x44   : > { %vm302_vm0 = vcmp.lt.s32.totalorder %v301_v2, 32  ;;  %v575_v23 = vld [vmem:[%s1076_s2] ss:$0 sm:$0xff]  ;;  %p760_p1 = scmp.ne.s32.totalorder %s1028_s14, %s759_s8  ;;  %s851_s25 = smov [#allocation8]  }
  0x45   : > { %v576_v28 = vld [vmem:[%s1078_s4] ss:$0 sm:$0xff]  ;;  %s763_s6 = sshll.u32 %s851_s25, 4  ;;  %s764_s6 = int_to_ptr.vmem [resolvable:$false] %s763_s6 }
  0x46   : > { %601 = vmatpush3.bf16.msra.mxu0 %v696_v10  ;;  %p761_p8 = pnand %p760_p1, %p969_p13  ;;  %s765_s9 = scalar_lea.vmem %s764_s6, 256 }
  0x47   : > { %602 = vmatprep.subr.bf16.mxu0 %v849_v9  ;;  %p766_p0 = scmp.lt.s32.totalorder %s1028_s14, %s764_s6  ;;  %p767_p2 = scmp.lt.s32.totalorder %s765_s9, %s759_s8 }
  0x48   : > { %p762_p10 = pneg %p761_p8 }
  0x49   : > { %p768_p3 = por %p767_p2, %p766_p0 }
  0x4a   : > { %603 = vmatpush3.bf16.msra.mxu0 %v697_v11 }
  0x4b   : > { %604 = vmatprep.subr.bf16.mxu0 %v849_v9  ;;  %p769_p5 = pnand %p768_p3, %p762_p10 }
  0x4e   : > { %605 = vmatpush3.bf16.msra.mxu0 %v698_v12 }
  0x4f   : > { %606 = vmatprep.subr.bf16.mxu0 %v849_v9 }
  0x52   : > { %607 = vmatpush3.bf16.msra.mxu0 %v699_v13 }
  0x53   : > { %608 = vmatprep.subr.bf16.mxu0 %v849_v9 }
  0x56   : > { %609 = vmatpush3.bf16.msra.mxu0 %v700_v14 }
  0x57   : > { %610 = vmatprep.subr.bf16.mxu0 %v849_v9 }
  0x5a   : > { %611 = vmatpush3.bf16.msra.mxu0 %v701_v15 }
  0x5b   : > { %612 = vmatprep.subr.bf16.mxu0 %v849_v9 }
  0x5e   : > { %613 = vmatpush3.bf16.msra.mxu0 %v702_v16 }
  0xca   : > { %v297_v3 = vpop.xlane.xlu0 %296 }
  0xcb   : > { %v298_v4 = vmul.f32 0.03125, %v297_v3 }
  0xcd   : > { %v299_v5 = vsub.f32 %v295_v0, %v298_v4 }
  0xcf   : > { %v303_v6 = vsel %vm302_vm0, %v299_v5, 0.0 }
  0xd0   : > { %v304_v7 = vmul.f32 %v303_v6, %v303_v6 }
  0xd2   : > { %305 = vadd.xlane.f32.xlu0 %v304_v7 }
 0x15b   : > { %v306_v17 = vpop.xlane.xlu0 %305 }
 0x15c   : > { %v307_v18 = vmul.f32 0.03125, %v306_v17 }
 0x15e   : > { %v308_v19 = vadd.f32 1e-05, %v307_v18 }
 0x160   : > { %703 = vrsqrt.f32 %v308_v19 }
 0x16d   : > { %v704_v20 = vpop.eup %703 }
 0x16e   : > { %v310_v22 = vmul.f32 %v704_v20, %v303_v6 }
 0x170   : > { %v318_v24 = vmul.f32 %v574_v21, %v310_v22 }
 0x172   : > { %v326_v25 = vadd.f32 %v575_v23, %v318_v24 }
 0x174   : > { %v327_v26 = vpack.c.bf16 %v326_v25, %v326_v25 }
 0x176   : > { %328 = vst [vmem:[#allocation2] sm:$0xf] %v327_v26 }
 0x17d   : > { %v329_v27 = vld [vmem:[#allocation2] sm:$0xf] }
 0x17e   : > { %615 = vmatmul.mubr.bf16.vlgmr.msra.gmra.mxu0 %v329_v27 }
 0x23e   : > { %v435_v29 = vpop.f32.mrf.mxu0 }
 0x23f   : > { %v436_v30 = vadd.f32 %v576_v28, %v435_v29 }
 0x240   : > { %v616_v31 = vpop.f32.mrf.mxu0 }
 0x241   : > { %v442_v32 = vadd.f32 %v436_v30, %v295_v0 }
 0x242   : > { %v438_v33 = vpop.f32.mrf.mxu0 }
 0x243   : > { %443 = vst [vmem:[%s286_s13] sm:$0xff] %v442_v32 }
 0x244   : > { %v617_v34 = vpop.f32.mrf.mxu0 }
 0x245   : > { %772 = shalt.err (!%p769_p5)
}
 0x246   : > { %s773_s3 = scalar_lea.hbm %s1026_s15, 128  ;;  %s777_s28 = scalar_lea.hbm %s1079_s5, 256 }
 0x247   : > { %p774_p7 = scmp.ne.s32.totalorder %s1026_s15, %s773_s3  ;;  %p778_p9 = scmp.lt.s32.totalorder %s1026_s15, %s1079_s5 }
 0x248   : > { %p779_p11 = scmp.lt.s32.totalorder %s777_s28, %s773_s3 }
 0x249   : > { %p775_p6 = pnand %p774_p7, %p969_p13 }
 0x24a   : > { %p780_p12 = por %p779_p11, %p778_p9 }
 0x24b   : > { %p776_p4 = pneg %p775_p6 }
 0x24d   : > { %p781_p1 = pnand %p780_p12, %p776_p4 }
 0x24f   : > { %784 = shalt.err (!%p781_p1)
}
 0x250   : > { %624 = dma.vmem_to_hbm [thread:$0]  (%p969_p13), %s1028_s14, 128, %s1026_s15, %s445_s21  }
 0x251 PF: > { %s471_s11 = sand.u32 1, %s823_s18   ;;  %p1095_p8 = scmp.ne.s32.totalorder %s1086_s29, 0 }
 0x252   : > { %p1096_p10 = scmp.ge.s32.totalorder %s843_s23, 2  ;;  %s472_s12 = scalar_lea.sflag [#allocation5], %s471_s11 }
 0x254   : > { %p635_p0 = pnand %p1096_p10, %p1095_p8 }
 0x256   : > { %p636_p2 = pneg %p635_p0 }
 0x258   : > { %818 = dma.done.wait (%p636_p2), %s472_s12, 128  }
 0x259   : > { %820 = vsyncadd (%p636_p2), %s472_s12, 4294967168  ;;  %s22_s23 = sadd.s32 1, %s843_s23   ;;  %s1097_s17 = sld [smem:[#allocation12_spill]] }
 0x25a   : > { %p19_p3 = scmp.ge.s32.totalorder %s22_s23, 4   ;;  %s1098_s18 = smov %s827_s19 }
 0x25b   : > { %s1099_s19 = smov %s831_s20  ;;  %s1100_s20 = smov %s978_s7 }
 0x25c   : > { %s1101_s21 = smov %s839_s22  ;;  %21 = sbr.rel (!%p19_p3) target bundleno = 9 (0x9), region = 97 }
 0x25f   : > { %s1102_s22 = smov %s1097_s17 }
 0x261   :  { %477 = vsyncpa [#allocation4], 1 }
 0x262   :  { %479 = vsyncpa [#allocation4 + $0x1], 1 }
 0x263   :  { %480 = vsyncpa [#allocation7], 1 }
 0x264   :  { %481 = vsyncpa [#allocation5], 1 }
 0x265   :  { %483 = vsyncpa [#allocation5 + $0x1], 1 }

</bundles_post_ra>
